<compile_context>
chip_gen: v5e
topology: v5e:2x2
jax: 0.10.0
libtpu: 0.0.40
codegen_flags: <defaults>
</compile_context>

<pallas_src>
import math
from functools import partial

import jax
import jax.numpy as jnp
from jax.experimental import pallas as pl
from jax.experimental.pallas import tpu as pltpu


# ~2 MiB per block: streaming kernels measure ~85-86% of HBM roofline from
# ~512 KiB up; 2 MiB keeps in+out double-buffered at 8 MiB, inside every
# chip's default scoped-VMEM (16 MiB v5e, 32 MiB v6e/v7x).
_TILE_TARGET_BYTES = 2 << 20


def _drop_path_kernel(keep_ref, x_ref, o_ref, *, scale):
    # keep_ref: (B,) int32 scalar-prefetch array in SMEM; 1 = keep, 0 = drop.
    # x_ref:    (1, rows, tile_lanes) VMEM tile of the current sample's payload.
    # o_ref:    output tile, same shape/dtype as x_ref.
    b = pl.program_id(0)
    kept = keep_ref[b] != 0

    @pl.when(kept)
    def _():
        # Multiply in f32, single cast on the way out (scale is a trace-time
        # Python float baked into the kernel).
        o_ref[...] = (x_ref[...].astype(jnp.float32) * jnp.float32(scale)
                      ).astype(o_ref.dtype)

    @pl.when(jnp.logical_not(kept))
    def _():
        # Dropped sample: write zeros directly and never touch x_ref — the
        # input index_map aliases dropped samples onto block (0, 0, 0) so the
        # pipeline can skip the re-fetch, and 0 * stale NaN/Inf would poison o.
        o_ref[...] = jnp.zeros_like(o_ref)


def _choose_layout(feat, itemsize):
    """Return (rows, inner, tile_lanes) or None when no clean layout exists.

    rows is the full sublane pack (8 f32 / 16 bf16 / 32 int8) so vregs carry
    no row padding; inner and tile_lanes are multiples of 128 so stores are
    unmasked. If feat does not factor that way we return None and the caller
    uses the fused XLA multiply instead of a degraded layout.
    """
    rows = max(1, 32 // itemsize)
    if feat % (rows * 128) != 0:
        return None
    inner = feat // rows
    target_lanes = max(128, (_TILE_TARGET_BYTES // (rows * itemsize)) // 128 * 128)
    # Balanced lane tiling: even-sized blocks near the target instead of one
    # big block plus a sliver tail paying full per-step overhead.
    n_blocks = pl.cdiv(inner, target_lanes)
    tile_lanes = pl.cdiv(pl.cdiv(inner, n_blocks), 128) * 128
    return rows, inner, tile_lanes


def drop_path(x, drop_prob, training, key, *, scale_by_keep=True,
              min_sample_bytes=256 << 10):
    """DropPath forward. x is NCHW (any trailing shape works); same shape/dtype out."""
    if (drop_prob is None) or (drop_prob == 0.0) or (not training):
        return x

    keep_prob = 1.0 - float(drop_prob)
    b = x.shape[0]
    feat = math.prod(x.shape[1:])
    itemsize = jnp.dtype(x.dtype).itemsize

    # Per-sample Bernoulli keep mask. The rescale factor is a trace-time
    # Python float (timm scale_by_keep guard: no divide by zero at p == 1.0).
    keep = jax.random.bernoulli(key, p=keep_prob, shape=(b,))
    scale = (1.0 / keep_prob) if (scale_by_keep and keep_prob > 0.0) else 1.0

    layout = _choose_layout(feat, itemsize)
    is_float = jnp.issubdtype(x.dtype, jnp.floating)

    # Bypass the standalone kernel when (a) the per-sample payload is small
    # enough that fixed per-step cost dominates, (b) feat cannot be laid out
    # sublane/lane dense, or (c) dtype is non-float. XLA fuses the broadcast
    # multiply into neighbouring ops for free in those cases.
    if (layout is None) or (not is_float) or (feat * itemsize < min_sample_bytes):
        bshape = (b,) + (1,) * (x.ndim - 1)
        s = keep.astype(jnp.float32).reshape(bshape) * jnp.float32(scale)
        return (x.astype(jnp.float32) * s).astype(x.dtype)

    rows, inner, tile_lanes = layout
    x3 = x.reshape(b, rows, inner)
    keep_i32 = keep.astype(jnp.int32)
    n_blocks = pl.cdiv(inner, tile_lanes)

    def x_index_map(ib, jf, keep_ref):
        # Dropped samples alias onto block (0, 0, 0): consecutive identical
        # block indices let the pipeline skip the input DMA, cutting HBM read
        # traffic by ~drop_prob. The kernel never reads x for those samples.
        kept = keep_ref[ib] != 0
        return (jnp.where(kept, ib, 0), 0, jnp.where(kept, jf, 0))

    def o_index_map(ib, jf, keep_ref):
        return (ib, 0, jf)

    out3 = pl.pallas_call(
        partial(_drop_path_kernel, scale=scale),
        out_shape=jax.ShapeDtypeStruct((b, rows, inner), x.dtype),
        grid_spec=pltpu.PrefetchScalarGridSpec(
            num_scalar_prefetch=1,
            grid=(b, n_blocks),
            in_specs=[pl.BlockSpec((1, rows, tile_lanes), x_index_map)],
            out_specs=pl.BlockSpec((1, rows, tile_lanes), o_index_map),
        ),
        compiler_params=pltpu.CompilerParams(
            dimension_semantics=("parallel", "parallel")),
        cost_estimate=pl.CostEstimate(
            flops=b * feat,
            bytes_accessed=2 * b * feat * itemsize + 4 * b,
            transcendentals=0),
    )(keep_i32, x3)

    return out3.reshape(x.shape)


class DropPath:
    """JAX/Pallas mirror of the PyTorch DropPath module."""

    def __init__(self, drop_prob=None, *, scale_by_keep=True,
                 min_sample_bytes=256 << 10):
        self.drop_prob = drop_prob
        self.scale_by_keep = scale_by_keep
        self.min_sample_bytes = min_sample_bytes
        self.training = True

    def __call__(self, x, key):
        return drop_path(x, self.drop_prob, self.training, key,
                         scale_by_keep=self.scale_by_keep,
                         min_sample_bytes=self.min_sample_bytes)


if __name__ == "__main__":
    key = jax.random.PRNGKey(0)
    k_x, k_mask = jax.random.split(key)

    # Small NCHW input consistent with the module's usage.
    x = jax.random.normal(k_x, (2, 4, 16, 16), dtype=jnp.float32)
    drop_prob = 0.25

    # min_sample_bytes=0 forces the Pallas path at this demo size (the default
    # bypasses small per-sample payloads where XLA fusion wins).
    mod = DropPath(drop_prob=drop_prob, min_sample_bytes=0)
    y = jax.block_until_ready(mod(x, k_mask))

    # Pure-JAX reference (same mask draw, same scale).
    keep_prob = 1.0 - drop_prob
    keep = jax.random.bernoulli(k_mask, p=keep_prob, shape=(2,)).astype(jnp.float32)
    scale = (keep / jnp.float32(keep_prob)).reshape(2, 1, 1, 1)
    y_ref = (x * scale).astype(x.dtype)
    assert jnp.allclose(y, y_ref, atol=1e-6), "mismatch vs reference"

    # drop_prob == 1.0: everything dropped, scale_by_keep guard -> zeros, no inf/NaN.
    y_all = jax.block_until_ready(
        drop_path(x, 1.0, True, k_mask, min_sample_bytes=0))
    assert jnp.allclose(y_all, jnp.zeros_like(x)), "drop_prob=1.0 must zero out"

    # Eval path (identity).
    mod.training = False
    y_eval = jax.block_until_ready(mod(x, k_mask))
    assert jnp.allclose(y_eval, x), "eval path must be identity"

    # bf16 at this tiny size cannot be laid out (16, 128k)-dense, so it takes
    # the fused XLA fallback; check it still matches the reference.
    mod.training = True
    xb = x.astype(jnp.bfloat16)
    yb = jax.block_until_ready(mod(xb, k_mask))
    yb_ref = (xb.astype(jnp.float32) * scale).astype(jnp.bfloat16)
    assert jnp.allclose(yb.astype(jnp.float32), yb_ref.astype(jnp.float32)), \
        "bf16 fallback mismatch"

    print("KERNEL_OK")
</pallas_src>

<mosaic_0001>
module attributes {stable_mosaic.version = 11 : i64} {
  func.func @_drop_path_kernel(%arg0: i32, %arg1: i32, %arg2: memref<2xi32, #tpu.memory_space<smem>>, %arg3: memref<1x8x128xf32, #tpu.memory_space<vmem>>, %arg4: memref<1x8x128xf32, #tpu.memory_space<vmem>>) attributes {dimension_semantics = [#tpu.dimension_semantics<parallel>, #tpu.dimension_semantics<parallel>], iteration_bounds = array<i64: 2, 1>, scalar_prefetch = 1 : i64, scratch_operands = 0 : i64, tpu.core_type = #tpu.core_type<tc>, window_params = [{transform_indices = @transform_0, window_bounds = array<i64: 1, 8, 128>}, {transform_indices = @transform_1, window_bounds = array<i64: 1, 8, 128>}]} {
    %0 = arith.index_cast %arg0 : i32 to index
    %1 = memref.load %arg2[%0] : memref<2xi32, #tpu.memory_space<smem>>
    %c0_i32 = arith.constant 0 : i32
    %2 = arith.cmpi ne, %1, %c0_i32 : i32
    %3 = arith.extui %2 : i1 to i32
    %c0_i32_0 = arith.constant 0 : i32
    %4 = arith.cmpi ne, %3, %c0_i32_0 : i32
    scf.if %4 {
      %c0 = arith.constant 0 : index
      %c0_2 = arith.constant 0 : index
      %c0_3 = arith.constant 0 : index
      %8 = vector.load %arg3[%c0, %c0_2, %c0_3] : memref<1x8x128xf32, #tpu.memory_space<vmem>>, vector<1x8x128xf32>
      %cst = arith.constant 1.33333337 : f32
      %9 = vector.broadcast %cst : f32 to vector<1x8x128xf32>
      %10 = arith.mulf %8, %9 : vector<1x8x128xf32>
      %c0_4 = arith.constant 0 : index
      %c0_5 = arith.constant 0 : index
      %c0_6 = arith.constant 0 : index
      %11 = vector.load %arg4[%c0_4, %c0_5, %c0_6] : memref<1x8x128xf32, #tpu.memory_space<vmem>>, vector<1x8x128xf32>
      tpu.vector_store %arg4[%c0_4, %c0_5, %c0_6], %10 {strides = array<i32>} : memref<1x8x128xf32, #tpu.memory_space<vmem>>, vector<1x8x128xf32>,
    } else {
    }
    %true = arith.constant true
    %5 = arith.xori %2, %true : i1
    %6 = arith.extui %5 : i1 to i32
    %c0_i32_1 = arith.constant 0 : i32
    %7 = arith.cmpi ne, %6, %c0_i32_1 : i32
    scf.if %7 {
      %cst = arith.constant 0.000000e+00 : f32
      %8 = vector.broadcast %cst : f32 to vector<1x8x128xf32>
      %c0 = arith.constant 0 : index
      %c0_2 = arith.constant 0 : index
      %c0_3 = arith.constant 0 : index
      %9 = vector.load %arg4[%c0, %c0_2, %c0_3] : memref<1x8x128xf32, #tpu.memory_space<vmem>>, vector<1x8x128xf32>
      tpu.vector_store %arg4[%c0, %c0_2, %c0_3], %8 {strides = array<i32>} : memref<1x8x128xf32, #tpu.memory_space<vmem>>, vector<1x8x128xf32>,
    } else {
    }
    return
  }
  func.func @transform_0(%arg0: i32, %arg1: i32, %arg2: memref<2xi32, #tpu.memory_space<smem>>) -> (i32, i32, i32) {
    %0 = arith.index_cast %arg0 : i32 to index
    %1 = memref.load %arg2[%0] : memref<2xi32, #tpu.memory_space<smem>>
    %c0_i32 = arith.constant 0 : i32
    %2 = arith.cmpi ne, %1, %c0_i32 : i32
    %c0_i32_0 = arith.constant 0 : i32
    %3 = arith.select %2, %arg0, %c0_i32_0 : i32
    %c0_i32_1 = arith.constant 0 : i32
    %4 = arith.select %2, %arg1, %c0_i32_1 : i32
    %c0_i32_2 = arith.constant 0 : i32
    %c0_i32_3 = arith.constant 0 : i32
    return %3, %c0_i32_2, %4 : i32, i32, i32
  }
  func.func @transform_1(%arg0: i32, %arg1: i32, %arg2: memref<2xi32, #tpu.memory_space<smem>>) -> (i32, i32, i32) {
    %c0_i32 = arith.constant 0 : i32
    %c0_i32_0 = arith.constant 0 : i32
    return %arg0, %c0_i32, %arg1 : i32, i32, i32
  }
}

</mosaic_0001>

<bundles_post_ra>
// kernel: tpu_custom_call.1
= control target key start
LH: loop header
LB: loop body
LE: loop exit
PB: predicated region body
PF: predicated region fallthrough
CT: control target
= control target key end

     0   :  { %s545_s12 = smov [#allocation3]   ;;  %s721_s0 = inlined_call_operand.hbm [shape: s32[2], index: 0, kind: input, shape index: {}]   ;;  %s722_s1 = inlined_call_operand.hbm [shape: f32[2,8,128], index: 1, kind: input, shape index: {}]   ;;  %s723_s2 = inlined_call_operand.hbm [shape: f32[2,8,128], index: 2, kind: output, shape index: {}]  }
   0x1   :  { %s8_s11 = sshll.u32 %s721_s0, 4  ;;  %s9_s11 = int_to_ptr.hbm [resolvable:$true] %s8_s11 }
   0x2   :  { %11 = dma.hbm_to_smem %s9_s11, 16, %s545_s12, [#allocation2] }
   0x3   :  { %499 = dma.done.wait [#allocation2], 16 }
   0x4   :  { %500 = vsyncadd [#allocation2], 4294967280 }
   0x5   :  { %14 = sfence }
   0x6   :  { %15 = vsyncpa [#allocation5], 0 }
   0x7   :  { %17 = vsyncpa [#allocation5 + $0x1], 0 }
   0x8   :  { %18 = vsyncpa [#allocation6], 0 }
   0x9   :  { %20 = vsyncpa [#allocation6 + $0x1], 0  ;;  %s565_s13 = smov 0   ;;  %s567_s14 = smov 0  }
   0xa   :  { %s569_s15 = smov 0   ;;  %s571_s16 = smov 0  }
   0xb   :  { %s573_s17 = smov 0   ;;  %s575_s0 = smov 0  }
   0xc   :  { %s577_s18 = smov 0   ;;  %s579_s19 = smov 0  }
   0xd   :  { %s581_s20 = smov 0  }
   0xe LB: > { %s286_s21 = sadd.s32 4294967295, %s543_s20   ;;  %s38_s22 = sadd.s32 1, %s539_s19  ;;  %s543_s20 = sphi %s581_s20, %s26_s20   ;;  %s539_s19 = sphi %s579_s19, %s735_s19   ;;  %s535_s18 = sphi %s577_s18, %s734_s18   ;;  %s531_s0 = sphi %s575_s0, %s733_s0   ;;  %s527_s17 = sphi %s573_s17, %s732_s17   ;;  %s523_s16 = sphi %s571_s16, %s731_s16   ;;  %s519_s15 = sphi %s569_s15, %s730_s15   ;;  %s515_s14 = sphi %s567_s14, %s729_s14   ;;  %s511_s13 = sphi %s565_s13, %s728_s13  }
   0xf   : > { %s42_s23 = sld [smem:[#allocation3 + %s539_s19]]  ;;  %s287_s24 = sadd.s32 4294967294, %s543_s20  }
  0x10   : > { %p40_p0 = scmp.ge.s32.totalorder %s38_s22, 2  ;;  %s55_s25 = sadd.s32 1, %s531_s0 }
  0x11   : > { %p62_p1 = scmp.ne.s32.totalorder %s531_s0, %s527_s17  ;;  %p63_p2 = scmp.eq.s32.totalorder %s543_s20, 0 }
  0x12   : > { %s737_s22 = smov (%p40_p0, %s38_s22), 0  ;;  %p68_p3 = scmp.ne.s32.totalorder %s527_s17, %s523_s16 }
  0x13   : > { %s46_s26 = sld [smem:[#allocation3 + %s737_s22]]  ;;  %p69_p4 = scmp.eq.s32.totalorder %s286_s21, 0 }
  0x14   : > { %s78_s27 = ssub.s32 %s539_s19, %s737_s22  ;;  %s83_s30 = sadd.s32 1, %s519_s15 }
  0x15   : > { %p43_p5 = scmp.ne.s32.totalorder %s42_s23, 0  ;;  %p622_p6 = por %p69_p4, %p68_p3 }
  0x16   : > { %p81_p7 = scmp.eq.s32.totalorder %s78_s27, 0  ;;  %p93_p8 = scmp.ne.s32.totalorder %s519_s15, %s515_s14 }
  0x17   : > { %s44_s29 = scalar_select %p43_p5, %s539_s19, 0 }
  0x18   : > { %s631_s3 = scalar_select %p81_p7, %s519_s15, %s83_s30  }
  0x19   : > { %p47_p9 = scmp.ne.s32.totalorder %s46_s26, 0  ;;  %p94_p10 = scmp.eq.s32.totalorder %s286_s21, 1 }
  0x1a   : > { %p99_p11 = scmp.ne.s32.totalorder %s515_s14, %s511_s13  ;;  %p100_p12 = scmp.eq.s32.totalorder %s287_s24, 1 }
  0x1b   : > { %s48_s4 = scalar_select %p47_p9, %s737_s22, 0 }
  0x1c   : > { %p636_p13 = por %p94_p10, %p93_p8  ;;  %p640_p0 = por %p100_p12, %p99_p11 }
  0x1d   : > { %s50_s7 = ssub.s32 %s44_s29, %s48_s4  ;;  %p289_p3 = scmp.ge.s32.totalorder %s543_s20, 2 }
  0x1e   : > { %p53_p4 = scmp.eq.s32.totalorder %s50_s7, 0  ;;  %p64_p5 = por %p63_p2, %p62_p1 }
  0x1f   : > { %p317_p7 = scmp.lt.s32.totalorder %s543_s20, 2  ;;  %s120_s9 = sand.u32 1, %s531_s0  }
  0x20   : > { %s652_s8 = scalar_select %p53_p4, %s531_s0, %s55_s25  }
  0x21   : > { %p655_p8 = pnand %p317_p7, %p64_p5  ;;  %p292_p9 = scmp.ge.s32.totalorder %s543_s20, 1 }
  0x22   : > { %s301_s11 = scalar_select %p64_p5, [#allocation3], [#allocation8] }
  0x23   : > { %s302_s12 = scalar_select %p64_p5, %s539_s19, 0 }
  0x24   : > { %s739_s11 = smov (!%p317_p7, %s301_s11), [#allocation9]  ;;  %s290_s21 = sshll.u32 %s120_s9, 3 }
  0x25   : > { %s741_s12 = smov (!%p317_p7, %s302_s12), 0  ;;  %p142_p10 = scmp.lt.s32.totalorder %s543_s20, 3 }
  0x26   : > { %s125_s16 = sld [smem:[%s739_s11 + %s741_s12]]  ;;  %s124_s23 = scalar_lea.vmem [#allocation4], %s290_s21 }
  0x27   : > { %p143_p11 = pnand %p292_p9, %p142_p10  ;;  %s137_s24 = sshll.u32 %s124_s23, 4  ;;  %s138_s24 = int_to_ptr.vmem [resolvable:$true] %s137_s24 }
  0x28   : > { %s121_s7 = scalar_lea.sflag [#allocation5], %s120_s9  ;;  %s148_s11 = sand.u32 (!%p143_p11), 1, %s527_s17  }
  0x29   : > { %s293_s12 = sshll.u32 (!%p143_p11), %s148_s11, 3 }
  0x2a   : > { %s152_s21 = scalar_lea.vmem (!%p143_p11), [#allocation4], %s293_s12 }
  0x2c   : > { %p126_p1 = scmp.ne.s32.totalorder %s125_s16, 0  ;;  %s149_s16 = scalar_lea.sflag (!%p143_p11), [#allocation5], %s148_s11 }
  0x2e   : > { %s127_s25 = scalar_select %p126_p1, %s539_s19, 0 }
  0x2f   : > { %146 = sbr.rel (%p143_p11) target bundleno = 94 (0x5e), region = 24 }
  0x30   : > { %s291_s26 = sshll.u32 %s127_s25, 3 }
  0x31   : > { %s133_s30 = scalar_lea.hbm %s722_s1, %s291_s26 }
  0x32   : > { %s135_s4 = sshll.u32 %s133_s30, 4  ;;  %s136_s4 = int_to_ptr.hbm [resolvable:$true] %s135_s4 }
  0x33   : > { %312 = dma.hbm_to_vmem [thread:$0]  (!%p655_p8), %s136_s4, 128, %s138_s24, %s121_s7  }
  0x34   : > { %502 = dma.done.wait (%p622_p6), %s149_s16, 128  }
  0x35   : > { %504 = vsyncadd (%p622_p6), %s149_s16, 4294967168  ;;  %s169_s23 = sand.u32 1, %s515_s14   ;;  %s176_s25 = sld [smem:[#allocation3 + %s535_s18]] }
  0x36   : > { %s294_s26 = sshll.u32 %s169_s23, 3 }
  0x37   : > { %s171_s9 = scalar_lea.vmem [#allocation7], %s294_s26 }
  0x3b   : > { %p295_p2 = scmp.eq.s32.totalorder %s176_s25, 0 }
  0x3d   : > { %180 = sbr.rel (%p295_p2) target bundleno = 70 (0x46), region = 32 }
  0x42   : > { %v181_v0 = vld [vmem:[%s152_s21] sm:$0xff] }
  0x43   : > { %v182_v1 = vmul.f32 1.3333334, %v181_v0 }
  0x45   : > { %183 = vst [vmem:[%s171_s9] sm:$0xff] %v182_v1 }
  0x46 PF: > { %p296_p12 = scmp.ne.s32.totalorder %s176_s25, 0 }
  0x48   : > { %187 = sbr.rel (%p296_p12) target bundleno = 79 (0x4f), region = 36 }
  0x4d   : > { %v546_v2 = vmov 0.0  }
  0x4e   : > { %188 = vst [vmem:[%s171_s9] sm:$0xff] %v546_v2 }
  0x4f PF: > { %s298_s28 = sshll.u32 %s535_s18, 3  ;;  %s203_s29 = sshll.u32 %s171_s9, 4  ;;  %s204_s29 = int_to_ptr.vmem [resolvable:$true] %s203_s29 }
  0x50   : > { %s201_s27 = scalar_lea.hbm %s723_s2, %s298_s28  ;;  %s190_s4 = scalar_lea.sflag [#allocation6], %s169_s23 }
  0x51   : > { %s205_s30 = sshll.u32 %s201_s27, 4  ;;  %s455_s18 = scalar_lea.hbm %s723_s2, 16  ;;  %s206_s30 = int_to_ptr.hbm [resolvable:$true] %s205_s30 }
  0x52   : > { %s449_s7 = sshra.s32 %s206_s30, 4  ;;  %s450_s7 = int_to_ptr.hbm [resolvable:$true] %s449_s7 }
  0x53   : > { %s451_s11 = scalar_lea.hbm %s450_s7, 8  ;;  %p456_p7 = scmp.lt.s32.totalorder %s450_s7, %s723_s2 }
  0x54   : > { %p452_p6 = scmp.ne.s32.totalorder %s450_s7, %s451_s11  ;;  %p457_p8 = scmp.lt.s32.totalorder %s455_s18, %s451_s11 }
  0x56   : > { %p453_p4 = pnand %p452_p6, %p636_p13  ;;  %p458_p9 = por %p457_p8, %p456_p7 }
  0x58   : > { %p454_p5 = pneg %p453_p4 }
  0x5a   : > { %p459_p10 = pnand %p458_p9, %p454_p5 }
  0x5c   : > { %462 = shalt.err (!%p459_p10)
}
  0x5d   : > { %305 = dma.vmem_to_hbm [thread:$0]  (%p636_p13), %s204_s29, 128, %s206_s30, %s190_s4  }
  0x5e PF: > { %s217_s23 = sand.u32 1, %s511_s13   ;;  %p314_p11 = pnand %p289_p3, %p640_p0 }
  0x5f   : > { %s218_s26 = scalar_lea.sflag [#allocation6], %s217_s23 }
  0x60   : > { %p315_p1 = pneg %p314_p11 }
  0x62   : > { %506 = dma.done.wait (%p315_p1), %s218_s26, 128  }
  0x63   : > { %508 = vsyncadd (%p315_p1), %s218_s26, 4294967168  ;;  %s26_s20 = sadd.s32 1, %s543_s20   ;;  %s728_s13 = smov %s515_s14 }
  0x64   : > { %p23_p2 = scmp.ge.s32.totalorder %s26_s20, 4   ;;  %s729_s14 = smov %s519_s15 }
  0x65   : > { %s730_s15 = smov %s631_s3  ;;  %s731_s16 = smov %s527_s17 }
  0x66   : > { %s732_s17 = smov %s531_s0  ;;  %s733_s0 = smov %s652_s8 }
  0x67   : > { %s734_s18 = smov %s539_s19  ;;  %s735_s19 = smov %s737_s22 }
  0x68   :  { %25 = sbr.rel (!%p23_p2) target bundleno = 14 (0xe), region = 77 }
  0x6d   :  { %224 = vsyncpa [#allocation5], 1 }
  0x6e   :  { %226 = vsyncpa [#allocation5 + $0x1], 1 }
  0x6f   :  { %227 = vsyncpa [#allocation6], 1 }
  0x70   :  { %229 = vsyncpa [#allocation6 + $0x1], 1 }

</bundles_post_ra>
